<compile_context>
chip_gen: v6e
topology: v6e:2x2x1
jax: 0.10.0
libtpu: 0.0.40
codegen_flags: <defaults>
</compile_context>

<pallas_src>
import functools

import jax
import jax.numpy as jnp
from jax import lax
from jax.experimental import pallas as pl
from jax.experimental.pallas import tpu as pltpu


def _round_up(n: int, m: int) -> int:
    return ((n + m - 1) // m) * m


def _pick_batch_tile(batch: int, seq_pad: int, target_rows: int = 1024) -> int:
    """Largest divisor of `batch` whose row count (tb * seq_pad) fits target_rows.

    Keeps at least 2 grid steps when batch >= 2 so dimension_semantics=("parallel",)
    can shard the grid across both TensorCores on v7x (no-op on v5e/v6e).
    target_rows ~1024-2048 suits v5e/v6e (128 MiB VMEM); ~512-768 suits v7x.
    """
    best = 1
    for tb in range(1, batch + 1):
        if batch % tb != 0:
            continue
        if batch >= 2 and batch // tb < 2:
            continue
        if tb * seq_pad <= max(target_rows, seq_pad):
            best = tb
    return best


def _mha_kernel(x_ref, wqkv_ref, bqkv_ref, wproj_ref, bproj_ref, out_ref,
                qkv_scr, hout_scr, *,
                emb_size: int, num_heads: int, seq_pad: int, seq_real: int,
                batch_tile: int):
    E, H, Np, N, TB = emb_size, num_heads, seq_pad, seq_real, batch_tile
    D = E // H

    # ---- Fused QKV projection for the whole batch tile (one K=E matmul). ----
    # x_ref is already bf16 (wrapper cast).  Result -> bf16 scratch so only one
    # full-width qkv copy stays live.
    qkv = jnp.dot(x_ref[...], wqkv_ref[...],
                  preferred_element_type=jnp.float32) + bqkv_ref[...]
    qkv_scr[...] = qkv.astype(jnp.bfloat16)                     # (TB*Np, 3E) bf16

    # Mask for padded key columns (only materialized when padding exists).
    if Np > N:
        key_valid = lax.broadcasted_iota(jnp.int32, (Np, Np), 1) < N

    def batch_body(b, carry):
        r = pl.multiple_of(b * Np, 8)            # Np is a multiple of 8
        for h in range(H):                        # H is small -> unrolled
            c = h * D
            qh = qkv_scr[pl.ds(r, Np), c:c + D]                  # (Np, D) bf16
            kh = qkv_scr[pl.ds(r, Np), E + c:E + c + D]
            vh = qkv_scr[pl.ds(r, Np), 2 * E + c:2 * E + c + D]

            energy = lax.dot_general(                            # (Np, Np) f32
                qh, kh, (((1,), (1,)), ((), ())),
                preferred_element_type=jnp.float32)
            if Np > N:
                energy = jnp.where(key_valid, energy, -1e30)

            m = jnp.max(energy, axis=-1, keepdims=True)
            p = jnp.exp(energy - m)                              # unnormalized, f32
            inv = pl.reciprocal(jnp.sum(p, axis=-1, keepdims=True), approx=True)

            # softmax(e) @ v == (p @ v) * (1/sum p); scale applied on (Np, D).
            oh = jnp.dot(p.astype(jnp.bfloat16), vh,
                         preferred_element_type=jnp.float32) * inv

            # Deferred projection: stash the head output, project all heads at once.
            hout_scr[pl.ds(r, Np), c:c + D] = oh.astype(jnp.bfloat16)
        return carry

    lax.fori_loop(0, TB, batch_body, 0)

    # ---- Single full-depth (K=E) projection over every row of the tile. ----
    # 1/sqrt(E) is already folded into wproj in the wrapper.
    out_ref[...] = (jnp.dot(hout_scr[...], wproj_ref[...],
                            preferred_element_type=jnp.float32)
                    + bproj_ref[...]).astype(out_ref.dtype)


def multi_head_attention_pallas(x, w_qkv, b_qkv, w_proj, b_proj, num_heads):
    """x: (B, N, E); w_qkv: (3E, E) PyTorch Linear weight; w_proj: (E, E)."""
    B, N, E = x.shape
    H = num_heads
    D = E // H
    out_dtype = x.dtype

    # Pad the sequence so every row block is sublane-aligned (and lane-dense for
    # long sequences, e.g. ViT's 197 -> 256).  Padded key columns are masked in
    # the kernel; padded query rows are sliced off below.
    lane_target = 128 if N >= 128 else 8
    N_pad = _round_up(N, lane_target)

    # Permute qkv output columns: original flat index = h*D*3 + d*3 + qkv ('(h d qkv)')
    # new layout: qkv*E + h*D + d  -> contiguous [Q | K | V], head-major within each.
    perm = jnp.arange(3 * E).reshape(H, D, 3).transpose(2, 0, 1).reshape(-1)
    wqkv_t = (w_qkv.T[:, perm]).astype(jnp.bfloat16)            # (E, 3E), y = x @ wqkv_t
    bqkv_p = b_qkv[perm][None, :].astype(jnp.float32)           # (1, 3E)
    # Fold the post-softmax 1/sqrt(E) into the projection weight (identical math).
    wproj_t = (w_proj.T / (E ** 0.5)).astype(jnp.bfloat16)      # (E, E)
    bproj_p = b_proj[None, :].astype(jnp.float32)               # (1, E)

    if N_pad != N:
        x = jnp.pad(x, ((0, 0), (0, N_pad - N), (0, 0)))
    # bf16 activation stream (MXU operand is bf16 anyway): halves HBM + VMEM traffic.
    x2 = x.reshape(B * N_pad, E).astype(jnp.bfloat16)

    TB = _pick_batch_tile(B, N_pad)
    grid = (B // TB,)

    kernel = functools.partial(_mha_kernel, emb_size=E, num_heads=H,
                               seq_pad=N_pad, seq_real=N, batch_tile=TB)

    out2 = pl.pallas_call(
        kernel,
        out_shape=jax.ShapeDtypeStruct((B * N_pad, E), out_dtype),
        grid=grid,
        in_specs=[
            pl.BlockSpec((TB * N_pad, E), lambda i: (i, 0)),        # x (pipelined, bf16)
            # Weights/biases: whole array resident in VMEM, single copy (no
            # per-step double-buffering for these constant-index operands).
            pl.BlockSpec(memory_space=pltpu.MemorySpace.VMEM),      # wqkv
            pl.BlockSpec(memory_space=pltpu.MemorySpace.VMEM),      # bqkv
            pl.BlockSpec(memory_space=pltpu.MemorySpace.VMEM),      # wproj (pre-scaled)
            pl.BlockSpec(memory_space=pltpu.MemorySpace.VMEM),      # bproj
        ],
        out_specs=pl.BlockSpec((TB * N_pad, E), lambda i: (i, 0)),
        scratch_shapes=[
            pltpu.VMEM((TB * N_pad, 3 * E), jnp.bfloat16),   # bf16 qkv (single copy)
            pltpu.VMEM((TB * N_pad, E), jnp.bfloat16),       # head outputs pre-projection
        ],
        compiler_params=pltpu.CompilerParams(
            dimension_semantics=("parallel",),
            # 48 MiB: headroom-safe on v7x (64 MiB physical); v5e/v6e (128 MiB)
            # can go higher together with a larger batch-tile target.
            vmem_limit_bytes=48 * 1024 * 1024,
        ),
    )(x2, wqkv_t, bqkv_p, wproj_t, bproj_p)

    out = out2.reshape(B, N_pad, E)
    if N_pad != N:
        out = out[:, :N, :]
    return out


def multi_head_attention_ref(x, w_qkv, b_qkv, w_proj, b_proj, num_heads):
    """Plain-JAX reference matching the PyTorch forward exactly (f32, HIGHEST)."""
    B, N, E = x.shape
    H = num_heads
    D = E // H
    hp = jax.lax.Precision.HIGHEST

    qkv = jnp.einsum('bne,fe->bnf', x, w_qkv, precision=hp) + b_qkv      # (B, N, 3E)
    qkv = qkv.reshape(B, N, H, D, 3).transpose(4, 0, 2, 1, 3)            # (3, B, H, N, D)
    q, k, v = qkv[0], qkv[1], qkv[2]

    energy = jnp.einsum('bhqd,bhkd->bhqk', q, k, precision=hp)
    att = jax.nn.softmax(energy, axis=-1) / (E ** 0.5)
    out = jnp.einsum('bhal,bhlv->bhav', att, v, precision=hp)
    out = out.transpose(0, 2, 1, 3).reshape(B, N, E)                     # 'b h n d -> b n (h d)'
    return jnp.einsum('bne,fe->bnf', out, w_proj, precision=hp) + b_proj


if __name__ == "__main__":
    B, N, E, H = 2, 8, 32, 4   # batch, seq, emb_size, num_heads (head_dim = 8)

    key = jax.random.PRNGKey(0)
    kx, kw1, kb1, kw2, kb2 = jax.random.split(key, 5)

    x = jax.random.normal(kx, (B, N, E), dtype=jnp.float32)
    w_qkv = 0.05 * jax.random.normal(kw1, (3 * E, E), dtype=jnp.float32)   # nn.Linear(E, 3E).weight
    b_qkv = 0.05 * jax.random.normal(kb1, (3 * E,), dtype=jnp.float32)
    w_proj = 0.05 * jax.random.normal(kw2, (E, E), dtype=jnp.float32)      # nn.Linear(E, E).weight
    b_proj = 0.05 * jax.random.normal(kb2, (E,), dtype=jnp.float32)

    out = multi_head_attention_pallas(x, w_qkv, b_qkv, w_proj, b_proj, H)
    out = jax.block_until_ready(out)

    ref = multi_head_attention_ref(x, w_qkv, b_qkv, w_proj, b_proj, H)
    assert out.shape == (B, N, E)
    # bf16 MXU operands (f32 accumulation) + EUP approx reciprocal -> slightly wider tol.
    assert jnp.allclose(out, ref, atol=2e-3, rtol=2e-3), (
        f"max abs err = {jnp.max(jnp.abs(out - ref))}")

    print("KERNEL_OK")
</pallas_src>

<mosaic_0001>
module attributes {stable_mosaic.version = 11 : i64} {
  func.func @_mha_kernel(%arg0: i32, %arg1: memref<8x32xbf16, #tpu.memory_space<vmem>>, %arg2: memref<32x96xbf16, #tpu.memory_space<vmem>>, %arg3: memref<1x96xf32, #tpu.memory_space<vmem>>, %arg4: memref<32x32xbf16, #tpu.memory_space<vmem>>, %arg5: memref<1x32xf32, #tpu.memory_space<vmem>>, %arg6: memref<8x32xf32, #tpu.memory_space<vmem>>, %arg7: memref<8x96xbf16, #tpu.memory_space<vmem>>, %arg8: memref<8x32xbf16, #tpu.memory_space<vmem>>) attributes {dimension_semantics = [#tpu.dimension_semantics<parallel>], iteration_bounds = array<i64: 2>, scalar_prefetch = 0 : i64, scratch_operands = 2 : i64, tpu.core_type = #tpu.core_type<tc>, window_params = [{transform_indices = @transform_0, window_bounds = array<i64: 8, 32>}, {pipeline_mode = #tpu.pipeline_mode<synchronous>, transform_indices = @transform_1, window_bounds = array<i64: 32, 96>}, {pipeline_mode = #tpu.pipeline_mode<synchronous>, transform_indices = @transform_2, window_bounds = array<i64: 1, 96>}, {pipeline_mode = #tpu.pipeline_mode<synchronous>, transform_indices = @transform_3, window_bounds = array<i64: 32, 32>}, {pipeline_mode = #tpu.pipeline_mode<synchronous>, transform_indices = @transform_4, window_bounds = array<i64: 1, 32>}, {transform_indices = @transform_5, window_bounds = array<i64: 8, 32>}]} {
    %c0 = arith.constant 0 : index
    %c0_0 = arith.constant 0 : index
    %0 = vector.load %arg1[%c0, %c0_0] : memref<8x32xbf16, #tpu.memory_space<vmem>>, vector<8x32xbf16>
    %c0_1 = arith.constant 0 : index
    %c0_2 = arith.constant 0 : index
    %1 = vector.load %arg2[%c0_1, %c0_2] : memref<32x96xbf16, #tpu.memory_space<vmem>>, vector<32x96xbf16>
    %cst = arith.constant dense<0.000000e+00> : vector<8x96xf32>
    %2 = tpu.matmul %0, %1, %cst {dimension_numbers = #tpu.dot_dimension_numbers<[1], [0], [0], [1], [0, 0, 1, 1], [], []>} : vector<8x32xbf16>, vector<32x96xbf16>, vector<8x96xf32> -> vector<8x96xf32>
    %c0_3 = arith.constant 0 : index
    %c0_4 = arith.constant 0 : index
    %3 = vector.load %arg3[%c0_3, %c0_4] : memref<1x96xf32, #tpu.memory_space<vmem>>, vector<1x96xf32>
    %4 = vector.broadcast %3 : vector<1x96xf32> to vector<8x96xf32>
    %5 = arith.addf %2, %4 : vector<8x96xf32>
    %6 = arith.truncf %5 : vector<8x96xf32> to vector<8x96xbf16>
    %c0_5 = arith.constant 0 : index
    %c0_6 = arith.constant 0 : index
    %7 = vector.load %arg7[%c0_5, %c0_6] : memref<8x96xbf16, #tpu.memory_space<vmem>>, vector<8x96xbf16>
    tpu.vector_store %arg7[%c0_5, %c0_6], %6 {strides = array<i32>} : memref<8x96xbf16, #tpu.memory_space<vmem>>, vector<8x96xbf16>,
    %c0_i32 = arith.constant 0 : i32
    %c8_i32 = arith.constant 8 : i32
    %8 = arith.muli %c0_i32, %c8_i32 : i32
    %9 = tpu.assume_multiple %8, 8 : i32
    %10 = arith.index_cast %9 : i32 to index
    %c0_7 = arith.constant 0 : index
    %11 = vector.load %arg7[%10, %c0_7] : memref<8x96xbf16, #tpu.memory_space<vmem>>, vector<8x8xbf16>
    %12 = arith.index_cast %9 : i32 to index
    %c32 = arith.constant 32 : index
    %13 = vector.load %arg7[%12, %c32] : memref<8x96xbf16, #tpu.memory_space<vmem>>, vector<8x8xbf16>
    %14 = arith.index_cast %9 : i32 to index
    %c64 = arith.constant 64 : index
    %15 = vector.load %arg7[%14, %c64] : memref<8x96xbf16, #tpu.memory_space<vmem>>, vector<8x8xbf16>
    %cst_8 = arith.constant dense<0.000000e+00> : vector<8x8xf32>
    %16 = tpu.matmul %11, %13, %cst_8 {dimension_numbers = #tpu.dot_dimension_numbers<[1], [1], [0], [0], [0, 0, 1, 0], [], []>} : vector<8x8xbf16>, vector<8x8xbf16>, vector<8x8xf32> -> vector<8x8xf32>
    %cst_9 = arith.constant dense<0xFF800000> : vector<8xf32>
    %17 = vector.multi_reduction <maximumf>, %16, %cst_9 [1] : vector<8x8xf32> to vector<8xf32>
    %18 = vector.shape_cast %17 : vector<8xf32> to vector<8x1xf32>
    %19 = vector.broadcast %18 : vector<8x1xf32> to vector<8x8xf32>
    %20 = arith.subf %16, %19 : vector<8x8xf32>
    %21 = math.exp %20 : vector<8x8xf32>
    %cst_10 = arith.constant dense<0.000000e+00> : vector<8xf32>
    %22 = vector.multi_reduction <add>, %21, %cst_10 [1] : vector<8x8xf32> to vector<8xf32>
    %23 = vector.shape_cast %22 : vector<8xf32> to vector<8x1xf32>
    %24 = tpu.reciprocal %23 {approx = true} : vector<8x1xf32> -> vector<8x1xf32>
    %25 = arith.truncf %21 : vector<8x8xf32> to vector<8x8xbf16>
    %cst_11 = arith.constant dense<0.000000e+00> : vector<8x8xf32>
    %26 = tpu.matmul %25, %15, %cst_11 {dimension_numbers = #tpu.dot_dimension_numbers<[1], [0], [0], [1], [0, 0, 1, 1], [], []>} : vector<8x8xbf16>, vector<8x8xbf16>, vector<8x8xf32> -> vector<8x8xf32>
    %27 = vector.broadcast %24 : vector<8x1xf32> to vector<8x8xf32>
    %28 = arith.mulf %26, %27 : vector<8x8xf32>
    %29 = arith.truncf %28 : vector<8x8xf32> to vector<8x8xbf16>
    %30 = arith.index_cast %9 : i32 to index
    %c0_12 = arith.constant 0 : index
    %31 = vector.load %arg8[%30, %c0_12] : memref<8x32xbf16, #tpu.memory_space<vmem>>, vector<8x8xbf16>
    tpu.vector_store %arg8[%30, %c0_12], %29 {strides = array<i32>} : memref<8x32xbf16, #tpu.memory_space<vmem>>, vector<8x8xbf16>,
    %32 = arith.index_cast %9 : i32 to index
    %c8 = arith.constant 8 : index
    %33 = vector.load %arg7[%32, %c8] : memref<8x96xbf16, #tpu.memory_space<vmem>>, vector<8x8xbf16>
    %34 = arith.index_cast %9 : i32 to index
    %c40 = arith.constant 40 : index
    %35 = vector.load %arg7[%34, %c40] : memref<8x96xbf16, #tpu.memory_space<vmem>>, vector<8x8xbf16>
    %36 = arith.index_cast %9 : i32 to index
    %c72 = arith.constant 72 : index
    %37 = vector.load %arg7[%36, %c72] : memref<8x96xbf16, #tpu.memory_space<vmem>>, vector<8x8xbf16>
    %cst_13 = arith.constant dense<0.000000e+00> : vector<8x8xf32>
    %38 = tpu.matmul %33, %35, %cst_13 {dimension_numbers = #tpu.dot_dimension_numbers<[1], [1], [0], [0], [0, 0, 1, 0], [], []>} : vector<8x8xbf16>, vector<8x8xbf16>, vector<8x8xf32> -> vector<8x8xf32>
    %cst_14 = arith.constant dense<0xFF800000> : vector<8xf32>
    %39 = vector.multi_reduction <maximumf>, %38, %cst_14 [1] : vector<8x8xf32> to vector<8xf32>
    %40 = vector.shape_cast %39 : vector<8xf32> to vector<8x1xf32>
    %41 = vector.broadcast %40 : vector<8x1xf32> to vector<8x8xf32>
    %42 = arith.subf %38, %41 : vector<8x8xf32>
    %43 = math.exp %42 : vector<8x8xf32>
    %cst_15 = arith.constant dense<0.000000e+00> : vector<8xf32>
    %44 = vector.multi_reduction <add>, %43, %cst_15 [1] : vector<8x8xf32> to vector<8xf32>
    %45 = vector.shape_cast %44 : vector<8xf32> to vector<8x1xf32>
    %46 = tpu.reciprocal %45 {approx = true} : vector<8x1xf32> -> vector<8x1xf32>
    %47 = arith.truncf %43 : vector<8x8xf32> to vector<8x8xbf16>
    %cst_16 = arith.constant dense<0.000000e+00> : vector<8x8xf32>
    %48 = tpu.matmul %47, %37, %cst_16 {dimension_numbers = #tpu.dot_dimension_numbers<[1], [0], [0], [1], [0, 0, 1, 1], [], []>} : vector<8x8xbf16>, vector<8x8xbf16>, vector<8x8xf32> -> vector<8x8xf32>
    %49 = vector.broadcast %46 : vector<8x1xf32> to vector<8x8xf32>
    %50 = arith.mulf %48, %49 : vector<8x8xf32>
    %51 = arith.truncf %50 : vector<8x8xf32> to vector<8x8xbf16>
    %52 = arith.index_cast %9 : i32 to index
    %c8_17 = arith.constant 8 : index
    %53 = vector.load %arg8[%52, %c8_17] : memref<8x32xbf16, #tpu.memory_space<vmem>>, vector<8x8xbf16>
    tpu.vector_store %arg8[%52, %c8_17], %51 {strides = array<i32>} : memref<8x32xbf16, #tpu.memory_space<vmem>>, vector<8x8xbf16>,
    %54 = arith.index_cast %9 : i32 to index
    %c16 = arith.constant 16 : index
    %55 = vector.load %arg7[%54, %c16] : memref<8x96xbf16, #tpu.memory_space<vmem>>, vector<8x8xbf16>
    %56 = arith.index_cast %9 : i32 to index
    %c48 = arith.constant 48 : index
    %57 = vector.load %arg7[%56, %c48] : memref<8x96xbf16, #tpu.memory_space<vmem>>, vector<8x8xbf16>
    %58 = arith.index_cast %9 : i32 to index
    %c80 = arith.constant 80 : index
    %59 = vector.load %arg7[%58, %c80] : memref<8x96xbf16, #tpu.memory_space<vmem>>, vector<8x8xbf16>
    %cst_18 = arith.constant dense<0.000000e+00> : vector<8x8xf32>
    %60 = tpu.matmul %55, %57, %cst_18 {dimension_numbers = #tpu.dot_dimension_numbers<[1], [1], [0], [0], [0, 0, 1, 0], [], []>} : vector<8x8xbf16>, vector<8x8xbf16>, vector<8x8xf32> -> vector<8x8xf32>
    %cst_19 = arith.constant dense<0xFF800000> : vector<8xf32>
    %61 = vector.multi_reduction <maximumf>, %60, %cst_19 [1] : vector<8x8xf32> to vector<8xf32>
    %62 = vector.shape_cast %61 : vector<8xf32> to vector<8x1xf32>
    %63 = vector.broadcast %62 : vector<8x1xf32> to vector<8x8xf32>
    %64 = arith.subf %60, %63 : vector<8x8xf32>
    %65 = math.exp %64 : vector<8x8xf32>
    %cst_20 = arith.constant dense<0.000000e+00> : vector<8xf32>
    %66 = vector.multi_reduction <add>, %65, %cst_20 [1] : vector<8x8xf32> to vector<8xf32>
    %67 = vector.shape_cast %66 : vector<8xf32> to vector<8x1xf32>
    %68 = tpu.reciprocal %67 {approx = true} : vector<8x1xf32> -> vector<8x1xf32>
    %69 = arith.truncf %65 : vector<8x8xf32> to vector<8x8xbf16>
    %cst_21 = arith.constant dense<0.000000e+00> : vector<8x8xf32>
    %70 = tpu.matmul %69, %59, %cst_21 {dimension_numbers = #tpu.dot_dimension_numbers<[1], [0], [0], [1], [0, 0, 1, 1], [], []>} : vector<8x8xbf16>, vector<8x8xbf16>, vector<8x8xf32> -> vector<8x8xf32>
    %71 = vector.broadcast %68 : vector<8x1xf32> to vector<8x8xf32>
    %72 = arith.mulf %70, %71 : vector<8x8xf32>
    %73 = arith.truncf %72 : vector<8x8xf32> to vector<8x8xbf16>
    %74 = arith.index_cast %9 : i32 to index
    %c16_22 = arith.constant 16 : index
    %75 = vector.load %arg8[%74, %c16_22] : memref<8x32xbf16, #tpu.memory_space<vmem>>, vector<8x8xbf16>
    tpu.vector_store %arg8[%74, %c16_22], %73 {strides = array<i32>} : memref<8x32xbf16, #tpu.memory_space<vmem>>, vector<8x8xbf16>,
    %76 = arith.index_cast %9 : i32 to index
    %c24 = arith.constant 24 : index
    %77 = vector.load %arg7[%76, %c24] : memref<8x96xbf16, #tpu.memory_space<vmem>>, vector<8x8xbf16>
    %78 = arith.index_cast %9 : i32 to index
    %c56 = arith.constant 56 : index
    %79 = vector.load %arg7[%78, %c56] : memref<8x96xbf16, #tpu.memory_space<vmem>>, vector<8x8xbf16>
    %80 = arith.index_cast %9 : i32 to index
    %c88 = arith.constant 88 : index
    %81 = vector.load %arg7[%80, %c88] : memref<8x96xbf16, #tpu.memory_space<vmem>>, vector<8x8xbf16>
    %cst_23 = arith.constant dense<0.000000e+00> : vector<8x8xf32>
    %82 = tpu.matmul %77, %79, %cst_23 {dimension_numbers = #tpu.dot_dimension_numbers<[1], [1], [0], [0], [0, 0, 1, 0], [], []>} : vector<8x8xbf16>, vector<8x8xbf16>, vector<8x8xf32> -> vector<8x8xf32>
    %cst_24 = arith.constant dense<0xFF800000> : vector<8xf32>
    %83 = vector.multi_reduction <maximumf>, %82, %cst_24 [1] : vector<8x8xf32> to vector<8xf32>
    %84 = vector.shape_cast %83 : vector<8xf32> to vector<8x1xf32>
    %85 = vector.broadcast %84 : vector<8x1xf32> to vector<8x8xf32>
    %86 = arith.subf %82, %85 : vector<8x8xf32>
    %87 = math.exp %86 : vector<8x8xf32>
    %cst_25 = arith.constant dense<0.000000e+00> : vector<8xf32>
    %88 = vector.multi_reduction <add>, %87, %cst_25 [1] : vector<8x8xf32> to vector<8xf32>
    %89 = vector.shape_cast %88 : vector<8xf32> to vector<8x1xf32>
    %90 = tpu.reciprocal %89 {approx = true} : vector<8x1xf32> -> vector<8x1xf32>
    %91 = arith.truncf %87 : vector<8x8xf32> to vector<8x8xbf16>
    %cst_26 = arith.constant dense<0.000000e+00> : vector<8x8xf32>
    %92 = tpu.matmul %91, %81, %cst_26 {dimension_numbers = #tpu.dot_dimension_numbers<[1], [0], [0], [1], [0, 0, 1, 1], [], []>} : vector<8x8xbf16>, vector<8x8xbf16>, vector<8x8xf32> -> vector<8x8xf32>
    %93 = vector.broadcast %90 : vector<8x1xf32> to vector<8x8xf32>
    %94 = arith.mulf %92, %93 : vector<8x8xf32>
    %95 = arith.truncf %94 : vector<8x8xf32> to vector<8x8xbf16>
    %96 = arith.index_cast %9 : i32 to index
    %c24_27 = arith.constant 24 : index
    %97 = vector.load %arg8[%96, %c24_27] : memref<8x32xbf16, #tpu.memory_space<vmem>>, vector<8x8xbf16>
    tpu.vector_store %arg8[%96, %c24_27], %95 {strides = array<i32>} : memref<8x32xbf16, #tpu.memory_space<vmem>>, vector<8x8xbf16>,
    %c1_i32 = arith.constant 1 : i32
    %c0_28 = arith.constant 0 : index
    %c0_29 = arith.constant 0 : index
    %98 = vector.load %arg8[%c0_28, %c0_29] : memref<8x32xbf16, #tpu.memory_space<vmem>>, vector<8x32xbf16>
    %c0_30 = arith.constant 0 : index
    %c0_31 = arith.constant 0 : index
    %99 = vector.load %arg4[%c0_30, %c0_31] : memref<32x32xbf16, #tpu.memory_space<vmem>>, vector<32x32xbf16>
    %cst_32 = arith.constant dense<0.000000e+00> : vector<8x32xf32>
    %100 = tpu.matmul %98, %99, %cst_32 {dimension_numbers = #tpu.dot_dimension_numbers<[1], [0], [0], [1], [0, 0, 1, 1], [], []>} : vector<8x32xbf16>, vector<32x32xbf16>, vector<8x32xf32> -> vector<8x32xf32>
    %c0_33 = arith.constant 0 : index
    %c0_34 = arith.constant 0 : index
    %101 = vector.load %arg5[%c0_33, %c0_34] : memref<1x32xf32, #tpu.memory_space<vmem>>, vector<1x32xf32>
    %102 = vector.broadcast %101 : vector<1x32xf32> to vector<8x32xf32>
    %103 = arith.addf %100, %102 : vector<8x32xf32>
    %c0_35 = arith.constant 0 : index
    %c0_36 = arith.constant 0 : index
    %104 = vector.load %arg6[%c0_35, %c0_36] : memref<8x32xf32, #tpu.memory_space<vmem>>, vector<8x32xf32>
    tpu.vector_store %arg6[%c0_35, %c0_36], %103 {strides = array<i32>} : memref<8x32xf32, #tpu.memory_space<vmem>>, vector<8x32xf32>,
    return
  }
  func.func @transform_0(%arg0: i32) -> (i32, i32) {
    %c0_i32 = arith.constant 0 : i32
    %c0_i32_0 = arith.constant 0 : i32
    return %arg0, %c0_i32 : i32, i32
  }
  func.func @transform_1(%arg0: i32) -> (i32, i32) {
    %c0_i32 = arith.constant 0 : i32
    %c0_i32_0 = arith.constant 0 : i32
    %c0_i32_1 = arith.constant 0 : i32
    return %c0_i32, %c0_i32_0 : i32, i32
  }
  func.func @transform_2(%arg0: i32) -> (i32, i32) {
    %c0_i32 = arith.constant 0 : i32
    %c0_i32_0 = arith.constant 0 : i32
    %c0_i32_1 = arith.constant 0 : i32
    return %c0_i32, %c0_i32_0 : i32, i32
  }
  func.func @transform_3(%arg0: i32) -> (i32, i32) {
    %c0_i32 = arith.constant 0 : i32
    %c0_i32_0 = arith.constant 0 : i32
    %c0_i32_1 = arith.constant 0 : i32
    return %c0_i32, %c0_i32_0 : i32, i32
  }
  func.func @transform_4(%arg0: i32) -> (i32, i32) {
    %c0_i32 = arith.constant 0 : i32
    %c0_i32_0 = arith.constant 0 : i32
    %c0_i32_1 = arith.constant 0 : i32
    return %c0_i32, %c0_i32_0 : i32, i32
  }
  func.func @transform_5(%arg0: i32) -> (i32, i32) {
    %c0_i32 = arith.constant 0 : i32
    %c0_i32_0 = arith.constant 0 : i32
    return %arg0, %c0_i32 : i32, i32
  }
}

</mosaic_0001>

<bundles_post_ra>
// kernel: tpu_custom_call.1
= control target key start
LH: loop header
LB: loop body
LE: loop exit
PB: predicated region body
PF: predicated region fallthrough
CT: control target
= control target key end

     0   :  { %10 = vsyncpa [#allocation5], 0  ;;  %s1694_s0 = inlined_call_operand.hbm [shape: bf16[16,32], index: 0, kind: input, shape index: {}]   ;;  %s1695_s1 = inlined_call_operand.hbm [shape: bf16[32,96], index: 1, kind: input, shape index: {}]   ;;  %s1696_s2 = inlined_call_operand.vmem [shape: f32[1,96], index: 2, kind: input, shape index: {}]   ;;  %s1697_s3 = inlined_call_operand.hbm [shape: bf16[32,32], index: 3, kind: input, shape index: {}]   ;;  %s1698_s4 = inlined_call_operand.vmem [shape: f32[1,32], index: 4, kind: input, shape index: {}]   ;;  %s1699_s5 = inlined_call_operand.hbm [shape: f32[16,32], index: 5, kind: output, shape index: {}]  }
   0x1   :  { %12 = vsyncpa [#allocation5 + $0x1], 0 }
   0x2   :  { %13 = vsyncpa [#allocation8], 0 }
   0x3   :  { %14 = vsyncpa [#allocation6], 0 }
   0x4   :  { %16 = vsyncpa [#allocation6 + $0x1], 0  ;;  %s1437_s18 = smov 0   ;;  %s1439_s19 = smov 0  }
   0x5   :  { %s1441_s20 = smov 0   ;;  %s1443_s21 = smov 0  }
   0x6 LB: > { %s1458_s22 = sadd.s32 4294967295, %s1383_s21   ;;  %s998_s23 = sadd.s32 4294967294, %s1383_s21   ;;  %s1383_s21 = sphi %s1443_s21, %s1721_s21   ;;  %s1379_s20 = sphi %s1441_s20, %s1720_s20   ;;  %s1375_s19 = sphi %s1439_s19, %s1719_s19   ;;  %s1371_s18 = sphi %s1437_s18, %s1718_s18  }
   0x7   : > { %p42_p0 = scmp.ne.s32.totalorder %s1375_s19, %s1371_s18  ;;  %p1700_p1 = scmp.eq.s32.totalorder %s1458_s22, 0 }
   0x8   : > { %p156_p3 = scmp.eq.s32.totalorder %s998_s23, 1  ;;  %p999_p5 = scmp.ge.s32.totalorder %s1383_s21, 1 }
   0x9   : > { %p1467_p4 = por %p1700_p1, %p42_p0  ;;  %p163_p7 = scmp.lt.s32.totalorder %s1383_s21, 3 }
   0xa   : > { %p1472_p6 = por %p156_p3, %p42_p0  ;;  %s1385_s27 = smov [#allocation7]  }
   0xb   : > { %s1704_s24 = scalar_select %p1467_p4, 1, 0 }
   0xc   : > { %s1705_s25 = scalar_select %p1472_p6, 1, 0 }
   0xd   : > { %p1477_p8 = pnand %p999_p5, %p163_p7  ;;  %s175_s28 = sshll.u32 %s1385_s27, 4  ;;  %s176_s28 = int_to_ptr.vmem [resolvable:$true] %s175_s28 }
   0xe   : > { %s1386_s30 = smov [#allocation9]   ;;  %s1246_s7 = scalar_lea.vmem %s176_s28, 256 }
   0xf   : > { %s1706_s26 = scalar_select %p1477_p8, 1, 0 }
  0x10   : > { %p1138_p9 = pneg %p1477_p8  ;;  %s191_s6 = sshll.u32 %s1386_s30, 4  ;;  %s192_s6 = int_to_ptr.vmem [resolvable:$true] %s191_s6 }
  0x11   : > { %p1247_p13 = scmp.ne.s32.totalorder %s176_s28, %s1246_s7  ;;  %p1254_p5 = scmp.lt.s32.totalorder %s176_s28, %s176_s28 }
  0x12   : > { %p1486_p11 = pnand %p1138_p9, %p1700_p1  ;;  %p1255_p7 = scmp.lt.s32.totalorder %s1246_s7, %s1246_s7 }
  0x14   : > { %p1237_p12 = pneg %p1486_p11  ;;  %p1256_p10 = por %p1255_p7, %p1254_p5 }
  0x16   : > { %p1249_p0 = pnand %p1247_p13, %p1237_p12 }
  0x18   : > { %p1250_p3 = pneg %p1249_p0 }
  0x1a   : > { %p1257_p9 = pnand %p1256_p10, %p1250_p3 }
  0x1c   : > { %1260 = shalt.err (!%p1257_p9)
}
  0x1d   : > { %s1387_s8 = smov 64   ;;  %s1388_s9 = smov 4  }
  0x1e   : > { %1141 = dma.hbm_to_vmem [thread:$0]  (!%p1486_p11), %s1695_s1, 256, %s176_s28, [#allocation8], %s1387_s8, %s1387_s8, %s1388_s9  }
  0x1f   : > { %s1272_s12 = scalar_lea.vmem %s192_s6, 256  ;;  %p1280_p2 = scmp.lt.s32.totalorder %s192_s6, %s192_s6 }
  0x20   : > { %p1273_p1 = scmp.ne.s32.totalorder %s192_s6, %s1272_s12  ;;  %p1281_p6 = scmp.lt.s32.totalorder %s1272_s12, %s1272_s12 }
  0x22   : > { %p1275_p13 = pnand %p1273_p1, %p1237_p12  ;;  %p1282_p5 = por %p1281_p6, %p1280_p2 }
  0x24   : > { %p1276_p0 = pneg %p1275_p13 }
  0x26   : > { %p1283_p10 = pnand %p1282_p5, %p1276_p0 }
  0x28   : > { %1286 = shalt.err (!%p1283_p10)
}
  0x29   : > { %1144 = dma.hbm_to_vmem [thread:$0]  (!%p1486_p11), %s1697_s3, 256, %s192_s6, [#allocation8], %s1387_s8, %s1387_s8, %s1388_s9  }
  0x2a   : > { %s1509_s15 = sadd.s32 1, %s1383_s21   ;;  %s29_s16 = sadd.s32 1, %s1379_s20 }
  0x2b   : > { %s26_s17 = ssub.s32 %s1383_s21, %s1509_s15  ;;  %p36_p1 = scmp.ne.s32.totalorder %s1379_s20, %s1375_s19 }
  0x2c   : > { %p27_p2 = scmp.eq.s32.totalorder %s26_s17, 0  ;;  %p37_p6 = scmp.eq.s32.totalorder %s1383_s21, 0 }
  0x2d   : > { %p1708_p12 = scmp.eq.s32.totalorder %s1458_s22, 1  ;;  %p1155_p7 = scmp.lt.s32.totalorder %s1383_s21, 2 }
  0x2e   : > { %s1525_s27 = scalar_select %p27_p2, %s1379_s20, %s29_s16  }
  0x2f   : > { %p1519_p3 = por %p1708_p12, %p36_p1  ;;  %p38_p9 = por %p37_p6, %p36_p1 }
  0x30   : > { %s208_s28 = sand.u32 1, %s1379_s20   ;;  %s1004_s30 = sshll.u32 %s1383_s21, 6 }
  0x31   : > { %s1709_s23 = scalar_select %p1519_p3, 1, 0 }
  0x32   : > { %s1003_s29 = sshll.u32 %s208_s28, 2  ;;  %s1532_s8 = scalar_lea.hbm %s1694_s0, %s1004_s30 }
  0x33   : > { %s212_s9 = scalar_lea.vmem [#allocation4], %s1003_s29  ;;  %p1534_p11 = pnand %p1155_p7, %p38_p9 }
  0x34   : > { %s219_s10 = sshll.u32 %s212_s9, 4  ;;  %s209_s12 = scalar_lea.sflag [#allocation5], %s208_s28  ;;  %s220_s10 = int_to_ptr.vmem [resolvable:$true] %s219_s10 }
  0x35   : > { %s1287_s13 = scalar_lea.hbm %s1532_s8, 64  ;;  %p1289_p0 = pneg %p1534_p11 }
  0x36   : > { %p1288_p13 = scmp.ne.s32.totalorder %s1532_s8, %s1287_s13  ;;  %s1292_s17 = scalar_lea.hbm %s1694_s0, 128 }
  0x37   : > { %p1293_p1 = scmp.lt.s32.totalorder %s1532_s8, %s1694_s0  ;;  %p1294_p2 = scmp.lt.s32.totalorder %s1292_s17, %s1287_s13 }
  0x38   : > { %p1290_p5 = pnand %p1289_p0, %p1288_p13 }
  0x39   : > { %p1295_p6 = por %p1294_p2, %p1293_p1 }
  0x3a   : > { %p1291_p10 = pneg %p1290_p5 }
  0x3c   : > { %p1296_p12 = pnand %p1295_p6, %p1291_p10 }
  0x3e   : > { %1299 = shalt.err (!%p1296_p12)
}
  0x3f   : > { %s1300_s6 = scalar_lea.vmem %s220_s10, 64  ;;  %s1389_s28 = smov [#allocation4]  }
  0x40   : > { %p1301_p7 = scmp.ne.s32.totalorder %s220_s10, %s1300_s6  ;;  %s1305_s7 = sshll.u32 %s1389_s28, 4  ;;  %s1306_s7 = int_to_ptr.vmem [resolvable:$false] %s1305_s7 }
  0x41   : > { %s1307_s9 = scalar_lea.vmem %s1306_s7, 128  ;;  %p1308_p13 = scmp.lt.s32.totalorder %s220_s10, %s1306_s7 }
  0x42   : > { %p1303_p9 = pnand %p1301_p7, %p1289_p0  ;;  %p1309_p5 = scmp.lt.s32.totalorder %s1307_s9, %s1300_s6 }
  0x44   : > { %p1304_p3 = pneg %p1303_p9  ;;  %p1310_p4 = por %p1309_p5, %p1308_p13 }
  0x46   : > { %p1311_p8 = pnand %p1310_p4, %p1304_p3 }
  0x48   : > { %1314 = shalt.err (!%p1311_p8)
}
  0x49   : > { %1148 = dma.hbm_to_vmem [thread:$0]  (!%p1534_p11), %s1532_s8, 64, %s220_s10, %s209_s12  }
  0x4a   : > { %p1711_p10 = scmp.ne.s32.totalorder %s1706_s26, 0 }
  0x4b   : > { %s1555_s13 = sand.u32 (!%p1711_p10), 1, %s1375_s19   ;;  %p1712_p0 = scmp.ne.s32.totalorder (!%p1711_p10), %s1704_s24, 0 }
  0x4c   : > { %228 = sbr.rel (%p1711_p10) target bundleno = 1360 (0x550), region = 40  ;;  %s1006_s14 = sshll.u32 (!%p1711_p10), %s1555_s13, 2 }
  0x4d   : > { %s231_s16 = scalar_lea.sflag (!%p1711_p10), [#allocation5], %s1555_s13  ;;  %s234_s17 = scalar_lea.vmem (!%p1711_p10), [#allocation4], %s1006_s14 }
  0x51   : > { %1358 = dma.done.wait (%p1712_p0), %s231_s16, 64  }
  0x52   : > { %1360 = vsyncadd (%p1712_p0), %s231_s16, 4294967232  ;;  %p1713_p4 = scmp.eq.s32.totalorder %s1458_s22, 0 }
  0x54   : > { %1362 = dma.done.wait (%p1713_p4), [#allocation8], 512   ;;  %p1714_p8 = pmov %p1713_p4 }
  0x55   : > { %v1390_v0 = vmov 0.0   ;;  %vm1391_vm0 = vmmov 0   ;;  %v1211_v1 = vld [vmem:[#allocation7 + $0x8] sm:$0xff]   ;;  %v1212_v2 = vld [vmem:[#allocation7] sm:$0xff]   ;;  %v270_v3 = vld [vmem:[%s234_s17] sm:$0xf] }
  0x56   : > { %1364 = vsyncadd (%p1714_p8), [#allocation8], 4294966784  ;;  %1062 = vmatprep.subr.bf16.mxu0 %v1390_v0  ;;  %1066 = vmatprep.mubr.msk.bf16.mxu0 %vm1391_vm0, %v1390_v0  ;;  %vm294_vm1 = vcmask 261120   ;;  %v1010_v4 = vld [vmem:[%s1696_s2] ss:$0 sm:$0xff]  ;;  %vm339_vm2 = vcmask 781312  }
  0x57   : > { %1070 = vmatprep.subr.bf16.mxu1 %v1390_v0  ;;  %1072 = vmatprep.mubr.msk.bf16.mxu1 %vm1391_vm0, %v1390_v0  ;;  %s1392_s8 = smov 120   ;;  %s1393_s10 = smov 96   ;;  %vm347_vm3 = vcmask 64512   ;;  %vm410_vm4 = vcmask 1043456   ;;  %vm456_vm5 = vcmask 60416   ;;  %vm579_vm6 = vcmask 126016  }
  0x58   : > { %1063 = vmatpush3.bf16.msra.mxu0 %v1211_v1  ;;  %s1394_s11 = smov 80   ;;  %s1395_s12 = smov 88   ;;  %vm702_vm7 = vcmask 191616   ;;  %vm825_vm8 = vcmask 257216  }
  0x59   : > { %1064 = vmatprep.subr.bf16.mxu0 %v1390_v0  ;;  %s1396_s30 = smov 72   ;;  %s1397_s29 = smov 112  }
  0x5a   : > { %s1398_s6 = smov 104   ;;  %s1399_s28 = smov 56  }
  0x5b   : > { %s1400_s7 = smov 64   ;;  %s1401_s9 = smov 40  }
  0x5c   : > { %1065 = vmatpush3.bf16.msra.mxu0 %v1212_v2  ;;  %s1402_s14 = smov 48   ;;  %s1403_s16 = smov 8  }
  0x5d   : > { %1076 = vmatprep.subr.bf16.mxu0 %v1390_v0  ;;  %s1404_s17 = smov 16   ;;  %s1405_s24 = smov 24  }
  0x5e   : > { %s1009_s26 = sshll.u32 %s1555_s13, 3  ;;  %p1715_p11 = scmp.ne.s32.totalorder %s1709_s23, 0 }
  0x5f   : > { %1067 = vmatmul.mubr.msk.bf16.vlgmr.msra.gmra.mxu0 %vm294_vm1, %v270_v3 }
  0x60   : > { %1078 = vmatprep.mubr.msk.bf16.mxu0 %vm1391_vm0, %v1390_v0 }
 0x11f   : > { %v332_v5 = vpop.f32.mrf.mxu0 }
 0x120   : > { %v333_v6 = vadd.f32 %v1010_v4, %v332_v5 }
 0x121   : > { %v1068_v7 = vpop.f32.mrf.mxu0 }
 0x122   : > { %v338_v8 = vpack.c.bf16 %v333_v6, %v333_v6 }
 0x123   : > { %v335_v9 = vpop.f32.mrf.mxu0 }
 0x124   : > { %340 = vst.msk [vmem:[#allocation2] sm:$0xf] %vm339_vm2, %v338_v8 }
 0x125   : > { %v1069_v10 = vpop.f32.mrf.mxu0 }
 0x12b   : > { %v1581_v11 = vld [vmem:[#allocation2] ss:$0 sps:$4 sm:$0xff]  }
 0x12c   : > { %v341_v12 = vld [vmem:[#allocation2] sm:$0xf]  ;;  %462 = vrot.lane.b32.xlu1 %v1581_v11, %s1392_s8 }
 0x12d   : > { %v1583_v13 = vcombine.low %v341_v12, %v341_v12  ;;  %v1587_v14 = vld [vmem:[#allocation2] ss:$0 sps:$4 sm:$0xff]  }
 0x12e   : > { %v1216_v15 = vld [vmem:[#allocation2] ss:$0 sps:$4 sm:$0xff]  }
 0x12f   : > { %345 = vrot.lane.b32.xlu0 %v1583_v13, %s1393_s10 }
 0x130   : > { %587 = vrot.lane.b32.xlu1 %v1587_v14, %s1394_s11  ;;  %s1034_s11 = sshll.u32 %s1458_s22, 7 }
 0x133   : > { %464 = vrot.lane.b32.xlu0 %v1581_v11, %s1395_s12  ;;  %s268_s12 = scalar_lea.vmem [#allocation10], %s1009_s26 }
 0x134   : > { %710 = vrot.lane.b32.xlu1 %v1216_v15, %s1396_s30  ;;  %s909_s30 = sshll.u32 %s268_s12, 4  ;;  %s1652_s30 = int_to_ptr.vmem [resolvable:$true] %s909_s30 }
 0x135   : > { %s1315_s22 = scalar_lea.vmem %s1652_s30, 128 }
 0x136   : > { %p1316_p3 = scmp.ne.s32.totalorder %s1652_s30, %s1315_s22 }
 0x137   : > { %585 = vrot.lane.b32.xlu0 %v1587_v14, %s1397_s29 }
 0x138   : > { %p1317_p1 = pnand %p1316_p3, %p1715_p11 }
 0x13a   : > { %p1318_p2 = pneg %p1317_p1 }
 0x13b   : > { %708 = vrot.lane.b32.xlu0 %v1216_v15, %s1398_s6 }
 0x19e   : > { %v463_v19 = vpop.permute.xlu1 %462 }
 0x1a1   : > { %v346_v16 = vpop.permute.xlu0 %345 }
 0x1a2   : > { %v352_v17 = vsel %vm347_vm3, %v346_v16, 0  ;;  %v588_v21 = vpop.permute.xlu1 %587 }
 0x1a3   : > { %1071 = vmatpush3.bf16.xpose.msra.mxu1 %v352_v17  ;;  %v593_v22 = vsel %vm347_vm3, %v588_v21, 0 }
 0x1a4   : > { %1082 = vmatprep.subr.bf16.mxu1 %v1390_v0 }
 0x1a5   : > { %v465_v18 = vpop.permute.xlu0 %464 }
 0x1a6   : > { %v470_v20 = vsel %vm347_vm3, %v465_v18, 0  ;;  %v711_v23 = vpop.permute.xlu1 %710 }
 0x1a7   : > { %v716_v25 = vsel %vm347_vm3, %v711_v23, 0 }
 0x1a9   : > { %v586_v24 = vpop.permute.xlu0 %585 }
 0x1aa   : > { %1073 = vmatmul.mubr.msk.bf16.vlgmr.msra.gmra.mxu1 %vm347_vm3, %v341_v12 }
 0x1ab   : > { %1083 = vmatpush3.bf16.xpose.msra.mxu1 %v470_v20  ;;  %1084 = vmatprep.mubr.msk.bf16.mxu1 %vm1391_vm0, %v1390_v0 }
 0x1ac   : > { %1094 = vmatprep.subr.bf16.mxu1 %v1390_v0 }
 0x1ad   : > { %v709_v26 = vpop.permute.xlu0 %708 }
 0x1b2   : > { %1085 = vmatmul.mubr.msk.bf16.vlgmr.msra.gmra.mxu1 %vm347_vm3, %v463_v19 }
 0x1b3   : > { %1095 = vmatpush3.bf16.xpose.msra.mxu1 %v593_v22  ;;  %1096 = vmatprep.mubr.msk.bf16.mxu1 %vm1391_vm0, %v1390_v0 }
 0x1b4   : > { %1106 = vmatprep.subr.bf16.mxu1 %v1390_v0 }
 0x1ba   : > { %1097 = vmatmul.mubr.msk.bf16.vlgmr.msra.gmra.mxu1 %vm347_vm3, %v586_v24 }
 0x1bb   : > { %1107 = vmatpush3.bf16.xpose.msra.mxu1 %v716_v25  ;;  %1108 = vmatprep.mubr.msk.bf16.mxu1 %vm1391_vm0, %v1390_v0 }
 0x1bc   : > { %1118 = vmatprep.subr.bf16.mxu1 %v1390_v0 }
 0x1c2   : > { %1109 = vmatmul.mubr.msk.bf16.vlgmr.msra.gmra.mxu1 %vm347_vm3, %v709_v26 }
 0x1c3   : > { %1122 = vmatprep.mubr.msk.bf16.mxu1 %vm1391_vm0, %v1390_v0 }
 0x26a   : > { %v388_v27 = vpop.f32.mrf.mxu1 }
 0x26b   : > { %v394_v28 = vsel %vm347_vm3, %v388_v27, -inf }
 0x26c   : > { %395 = vmax.xlane.f32.xlu1 %v394_v28  ;;  %v1074_v29 = vpop.f32.mrf.mxu1 }
 0x26e   : > { %v391_v30 = vpop.f32.mrf.mxu1 }
 0x270   : > { %v1075_v31 = vpop.f32.mrf.mxu1 }
 0x272   : > { %v506_v32 = vpop.f32.mrf.mxu1 }
 0x273   : > { %v512_v33 = vsel %vm347_vm3, %v506_v32, -inf }
 0x274   : > { %513 = vmax.xlane.f32.xlu0 %v512_v33  ;;  %v1086_v34 = vpop.f32.mrf.mxu1 }
 0x276   : > { %v509_v35 = vpop.f32.mrf.mxu1 }
 0x278   : > { %v1087_v36 = vpop.f32.mrf.mxu1 }
 0x27a   : > { %v629_v37 = vpop.f32.mrf.mxu1 }
 0x27b   : > { %v635_v38 = vsel %vm347_vm3, %v629_v37, -inf }
 0x27c   : > { %636 = vmax.xlane.f32.xlu0 %v635_v38  ;;  %v1098_v39 = vpop.f32.mrf.mxu1 }
 0x27d   : > { %523 = vrot.lane.b32.xlu1 %v1581_v11, %s1399_s28  ;;  %s1650_s28 = scalar_lea.hbm %s1699_s5, %s1034_s11 }
 0x27e   : > { %v632_v40 = vpop.f32.mrf.mxu1 }
 0x27f   : > { %v1217_v40 = vld [vmem:[#allocation9 + $0x8] sm:$0xff]  }
 0x280   : > { %v1099_v41 = vpop.f32.mrf.mxu1  ;;  %1119 = vmatpush3.bf16.msra.mxu1 %v1217_v40 }
 0x281   : > { %1120 = vmatprep.subr.bf16.mxu1 %v1390_v0 }
 0x282   : > { %v752_v42 = vpop.f32.mrf.mxu1 }
 0x283   : > { %v758_v46 = vsel %vm347_vm3, %v752_v42, -inf }
 0x284   : > { %v1110_v43 = vpop.f32.mrf.mxu1 }
 0x286   : > { %v755_v44 = vpop.f32.mrf.mxu1 }
 0x288   : > { %v1111_v45 = vpop.f32.mrf.mxu1 }
 0x292   : > { %405 = vrot.lane.b32.xlu0 %v1583_v13, %s1400_s7  ;;  %s896_s7 = scalar_lea.sflag [#allocation6], %s1555_s13 }
 0x296   : > { %769 = vrot.lane.b32.xlu0 %v1216_v15, %s1401_s9  ;;  %s1406_s9 = smov [#allocation10]  }
 0x2a1   : > { %759 = vmax.xlane.f32.xlu1 %v758_v46 }
 0x2b2   : > { %646 = vrot.lane.b32.xlu1 %v1587_v14, %s1402_s14  ;;  %s1319_s14 = sshll.u32 %s1406_s9, 4  ;;  %s1320_s14 = int_to_ptr.vmem [resolvable:$false] %s1319_s14 }
 0x2b3   : > { %p1322_p6 = scmp.lt.s32.totalorder %s1652_s30, %s1320_s14 }
 0x2f5   : > { %v396_v47 = vpop.xlane.xlu1 %395 }
 0x2f6   : > { %v397_v48 = vsub.f32 %v388_v27, %v396_v47 }
 0x2f8   : > { %v398_v49 = vmul.f32 1.442695, %v397_v48 }
 0x2f9   : > { %v524_v59 = vpop.permute.xlu1 %523 }
 0x2fa   : > { %1219 = vpow2.f32 %v398_v49  ;;  %v529_v61 = vsel %vm410_vm4, %v524_v59, 0 }
 0x2fd   : > { %v514_v50 = vpop.xlane.xlu0 %513 }
 0x2fe   : > { %v515_v51 = vsub.f32 %v506_v32, %v514_v50 }
 0x300   : > { %v516_v52 = vmul.f32 1.442695, %v515_v51 }
 0x302   : > { %1221 = vpow2.f32 %v516_v52 }
 0x305   : > { %v637_v53 = vpop.xlane.xlu0 %636 }
 0x306   : > { %v638_v54 = vsub.f32 %v629_v37, %v637_v53  ;;  %v1029_v53 = vld [vmem:[%s1698_s4] ss:$0 sm:$0xff] }
 0x307   : > { %v1220_v56 = vpop.eup %1219 }
 0x308   : > { %v639_v55 = vmul.f32 1.442695, %v638_v54  ;;  %v404_v60 = vpack.c.bf16 %v1220_v56, %v1220_v56  ;;  %v400_v1 = vsel %vm347_vm3, %v1220_v56, 0.0 }
 0x309   : > { %v406_v57 = vpop.permute.xlu0 %405 }
 0x30a   : > { %1223 = vpow2.f32 %v639_v55  ;;  %v412_v58 = vsel %vm410_vm4, %v406_v57, 0 }
 0x30b   : > { %1077 = vmatpush3.bf16.msra.mxu0 %v412_v58 }
 0x30c   : > { %1088 = vmatprep.subr.bf16.mxu0 %v1390_v0 }
 0x30d   : > { %v770_v10 = vpop.permute.xlu0 %769 }
 0x30e   : > { %1079 = vmatmul.mubr.msk.bf16.vlgmr.msra.gmra.mxu0 %vm347_vm3, %v404_v60  ;;  %v775_v12 = vsel %vm410_vm4, %v770_v10, 0 }
 0x30f   : > { %v1222_v62 = vpop.eup %1221  ;;  %1089 = vmatpush3.bf16.msra.mxu0 %v529_v61  ;;  %1090 = vmatprep.mubr.msk.bf16.mxu0 %vm1391_vm0, %v1390_v0 }
 0x310   : > { %v518_v63 = vsel %vm347_vm3, %v1222_v62, 0.0  ;;  %1100 = vmatprep.subr.bf16.mxu0 %v1390_v0  ;;  %v522_v2 = vpack.c.bf16 %v1222_v62, %v1222_v62 }
 0x311   : > { %519 = vadd.xlane.f32.xlu1 %v518_v63 }
 0x315   : > { %401 = vadd.xlane.f32.xlu1 %v400_v1 }
 0x316   : > { %1091 = vmatmul.mubr.msk.bf16.vlgmr.msra.gmra.mxu0 %vm347_vm3, %v522_v2 }
 0x317   : > { %v1224_v3 = vpop.eup %1223  ;;  %1102 = vmatprep.mubr.msk.bf16.mxu0 %vm1391_vm0, %v1390_v0 }
 0x318   : > { %v641_v4 = vsel %vm347_vm3, %v1224_v3, 0.0  ;;  %v645_v11 = vpack.c.bf16 %v1224_v3, %v1224_v3 }
 0x319   : > { %642 = vadd.xlane.f32.xlu0 %v641_v4 }
 0x32a   : > { %v760_v5 = vpop.xlane.xlu1 %759 }
 0x32b   : > { %v761_v6 = vsub.f32 %v752_v42, %v760_v5  ;;  %v1218_v42 = vld [vmem:[#allocation9] sm:$0xff]  }
 0x32c   : > { %1121 = vmatpush3.bf16.msra.mxu1 %v1218_v42 }
 0x32d   : > { %v762_v7 = vmul.f32 1.442695, %v761_v6 }
 0x32e   : > { %v647_v8 = vpop.permute.xlu1 %646 }
 0x32f   : > { %1225 = vpow2.f32 %v762_v7  ;;  %v652_v9 = vsel %vm410_vm4, %v647_v8, 0 }
 0x330   : > { %1101 = vmatpush3.bf16.msra.mxu0 %v652_v9 }
 0x331   : > { %1112 = vmatprep.subr.bf16.mxu0 %v1390_v0 }
 0x333   : > { %1103 = vmatmul.mubr.msk.bf16.vlgmr.msra.gmra.mxu0 %vm347_vm3, %v645_v11 }
 0x334   : > { %1113 = vmatpush3.bf16.msra.mxu0 %v775_v12  ;;  %1114 = vmatprep.mubr.msk.bf16.mxu0 %vm1391_vm0, %v1390_v0 }
 0x33c   : > { %v1226_v13 = vpop.eup %1225 }
 0x33d   : > { %v764_v14 = vsel %vm347_vm3, %v1226_v13, 0.0  ;;  %v768_v15 = vpack.c.bf16 %v1226_v13, %v1226_v13 }
 0x33e   : > { %765 = vadd.xlane.f32.xlu0 %v764_v14 }
 0x33f   : > { %1115 = vmatmul.mubr.msk.bf16.vlgmr.msra.gmra.mxu0 %vm347_vm3, %v768_v15 }
 0x39a   : > { %v520_v16 = vpop.xlane.xlu1 %519 }
 0x39e   : > { %v402_v17 = vpop.xlane.xlu1 %401 }
 0x39f   : > { %1227 = vrcp.f32 %v402_v17 }
 0x3a0   : > { %1229 = vrcp.f32 %v520_v16 }
 0x3a2   : > { %v643_v32 = vpop.xlane.xlu0 %642 }
 0x3a3   : > { %1231 = vrcp.f32 %v643_v32 }
 0x3ac   : > { %v1228_v18 = vpop.eup %1227 }
 0x3ad   : > { %v1230_v25 = vpop.eup %1229 }
 0x3b0   : > { %v1232_v34 = vpop.eup %1231 }
 0x3c7   : > { %v766_v33 = vpop.xlane.xlu0 %765 }
 0x3c8   : > { %1233 = vrcp.f32 %v766_v33 }
 0x3ce   : > { %v448_v19 = vpop.f32.mrf.mxu0 }
 0x3cf   : > { %v454_v20 = vmul.f32 %v1228_v18, %v448_v19 }
 0x3d0   : > { %v1080_v21 = vpop.f32.mrf.mxu0 }
 0x3d1   : > { %v455_v22 = vpack.c.bf16 %v454_v20, %v454_v20 }
 0x3d2   : > { %v451_v23 = vpop.f32.mrf.mxu0 }
 0x3d3   : > { %457 = vst.msk [vmem:[#allocation3] sm:$0xf] %vm456_vm5, %v455_v22 }
 0x3d4   : > { %v1081_v24 = vpop.f32.mrf.mxu0 }
 0x3d5   : > { %v1234_v43 = vpop.eup %1233 }
 0x3d6   : > { %v565_v26 = vpop.f32.mrf.mxu0 }
 0x3d7   : > { %v571_v27 = vmul.f32 %v1230_v25, %v565_v26 }
 0x3d8   : > { %v1092_v28 = vpop.f32.mrf.mxu0 }
 0x3d9   : > { %v1037_v29 = vpack.c.bf16 %v571_v27, %v571_v27 }
 0x3da   : > { %v568_v30 = vpop.f32.mrf.mxu0 }
 0x3db   : > { %576 = vrot.lane.b32.xlu0 %v1037_v29, %s1403_s16  ;;  %s1321_s16 = scalar_lea.vmem %s1320_s14, 256 }
 0x3dc   : > { %v1093_v31 = vpop.f32.mrf.mxu0  ;;  %p1323_p12 = scmp.lt.s32.totalorder %s1321_s16, %s1315_s22 }
 0x3de   : > { %p1324_p7 = por %p1323_p12, %p1322_p6 }
 0x3e0   : > { %p1325_p9 = pnand %p1324_p7, %p1318_p2 }
 0x3f3   : > { %v688_v35 = vpop.f32.mrf.mxu0 }
 0x3f4   : > { %v694_v36 = vmul.f32 %v1232_v34, %v688_v35 }
 0x3f5   : > { %v1104_v37 = vpop.f32.mrf.mxu0 }
 0x3f6   : > { %v1038_v38 = vpack.c.bf16 %v694_v36, %v694_v36 }
 0x3f7   : > { %v691_v39 = vpop.f32.mrf.mxu0 }
 0x3f8   : > { %699 = vrot.lane.b32.xlu1 %v1038_v38, %s1404_s17 }
 0x3f9   : > { %v1105_v41 = vpop.f32.mrf.mxu0 }
 0x3ff   : > { %v811_v44 = vpop.f32.mrf.mxu0 }
 0x400   : > { %v817_v45 = vmul.f32 %v1234_v43, %v811_v44 }
 0x401   : > { %v1116_v46 = vpop.f32.mrf.mxu0 }
 0x402   : > { %v1039_v47 = vpack.c.bf16 %v817_v45, %v817_v45 }
 0x403   : > { %v814_v48 = vpop.f32.mrf.mxu0 }
 0x404   : > { %822 = vrot.lane.b32.xlu1 %v1039_v47, %s1405_s24 }
 0x405   : > { %v1117_v49 = vpop.f32.mrf.mxu0 }
 0x44d   : > { %v577_v50 = vpop.permute.xlu0 %576 }
 0x44e   : > { %580 = vst.msk [vmem:[#allocation3] sm:$0xf] %vm579_vm6, %v577_v50 }
 0x46a   : > { %v700_v51 = vpop.permute.xlu1 %699 }
 0x46b   : > { %703 = vst.msk [vmem:[#allocation3] sm:$0xf] %vm702_vm7, %v700_v51 }
 0x476   : > { %v823_v0 = vpop.permute.xlu1 %822 }
 0x477   : > { %826 = vst.msk [vmem:[#allocation3] sm:$0xf] %vm825_vm8, %v823_v0 }
 0x47e   : > { %v827_v52 = vld [vmem:[#allocation3] sm:$0xf] }
 0x47f   : > { %1123 = vmatmul.mubr.msk.bf16.vlgmr.msra.gmra.mxu1 %vm294_vm1, %v827_v52 }
 0x53f   : > { %v888_v54 = vpop.f32.mrf.mxu1 }
 0x540   : > { %v889_v55 = vadd.f32 %v1029_v53, %v888_v54 }
 0x541   : > { %v1124_v56 = vpop.f32.mrf.mxu1 }
 0x542   : > { %894 = vst.msk [vmem:[%s268_s12] sm:$0xff] %vm294_vm1, %v889_v55 }
 0x543   : > { %v891_v57 = vpop.f32.mrf.mxu1 }
 0x544   : > { %1328 = shalt.err (!%p1325_p9)
}
 0x545   : > { %s1329_s17 = scalar_lea.hbm %s1650_s28, 128  ;;  %s1333_s26 = scalar_lea.hbm %s1699_s5, 256 }
 0x546   : > { %p1330_p13 = scmp.ne.s32.totalorder %s1650_s28, %s1329_s17  ;;  %p1334_p0 = scmp.lt.s32.totalorder %s1650_s28, %s1699_s5 }
 0x547   : > { %p1335_p4 = scmp.lt.s32.totalorder %s1333_s26, %s1329_s17 }
 0x548   : > { %p1331_p5 = pnand %p1330_p13, %p1715_p11 }
 0x549   : > { %p1336_p8 = por %p1335_p4, %p1334_p0 }
 0x54a   : > { %p1332_p10 = pneg %p1331_p5 }
 0x54c   : > { %p1337_p3 = pnand %p1336_p8, %p1332_p10 }
 0x54e   : > { %1340 = shalt.err (!%p1337_p3)
}
 0x54f   : > { %1136 = dma.vmem_to_hbm [thread:$0]  (%p1715_p11), %s1652_s30, 128, %s1650_s28, %s896_s7   ;;  %v1125_v58 = vpop.f32.mrf.mxu1 }
 0x550 PF: > { %s921_s11 = sand.u32 1, %s1371_s18   ;;  %p1716_p1 = scmp.ne.s32.totalorder %s1705_s25, 0 }
 0x551   : > { %p1717_p2 = scmp.ge.s32.totalorder %s1383_s21, 2  ;;  %s922_s12 = scalar_lea.sflag [#allocation6], %s921_s11 }
 0x553   : > { %p1150_p6 = pnand %p1717_p2, %p1716_p1 }
 0x555   : > { %p1151_p12 = pneg %p1150_p6 }
 0x557   : > { %1366 = dma.done.wait (%p1151_p12), %s922_s12, 128  }
 0x558   : > { %1368 = vsyncadd (%p1151_p12), %s922_s12, 4294967168  ;;  %p19_p7 = scmp.ge.s32.totalorder %s1509_s15, 4   ;;  %s1718_s18 = smov %s1375_s19 }
 0x559   : > { %s1719_s19 = smov %s1379_s20  ;;  %s1720_s20 = smov %s1525_s27 }
 0x55a   : > { %s1721_s21 = smov %s1509_s15  ;;  %21 = sbr.rel (!%p19_p7) target bundleno = 6 (0x6), region = 93 }
 0x55f   :  { %927 = vsyncpa [#allocation5], 1 }
 0x560   :  { %929 = vsyncpa [#allocation5 + $0x1], 1 }
 0x561   :  { %930 = vsyncpa [#allocation8], 1 }
 0x562   :  { %931 = vsyncpa [#allocation6], 1 }
 0x563   :  { %933 = vsyncpa [#allocation6 + $0x1], 1 }

</bundles_post_ra>
